<compile_context>
chip_gen: v5e
topology: v5e:2x2
jax: 0.10.0
libtpu: 0.0.40
codegen_flags: <defaults>
</compile_context>

<pallas_src>
import functools

import jax
import jax.numpy as jnp
from jax.experimental import pallas as pl
from jax.experimental.pallas import tpu as pltpu


# ----------------------------------------------------------------------------
# Glue: interpolation-matrix construction / tiling helpers (plain JAX / Python)
# ----------------------------------------------------------------------------
def _round_up(x: int, m: int) -> int:
    return ((x + m - 1) // m) * m


def _bilinear_matrix(in_size: int, out_size: int, out_pad: int, dtype) -> jnp.ndarray:
    """(out_pad, in_size) bilinear interpolation matrix matching
    torch.nn.functional.interpolate(mode='bilinear', align_corners=False,
    antialias=False). Rows >= out_size are exactly zero (padding)."""
    scale = in_size / out_size
    dst = jnp.arange(out_size, dtype=jnp.float32)
    src = jnp.maximum((dst + 0.5) * scale - 0.5, 0.0)
    i0 = jnp.clip(jnp.floor(src).astype(jnp.int32), 0, in_size - 1)
    i1 = jnp.clip(i0 + 1, 0, in_size - 1)
    lam = src - i0.astype(jnp.float32)
    rows = jnp.arange(out_size)
    w = jnp.zeros((out_pad, in_size), jnp.float32)
    w = w.at[rows, i0].add(1.0 - lam)
    w = w.at[rows, i1].add(lam)
    return w.astype(dtype)


def _pick_tile(extent: int, unit: int, cap: int) -> int:
    """Largest multiple of `unit` <= cap that covers `extent` in one tile when
    possible. Never degenerates to `unit` for awkward extents — the extent is
    padded up to a tile multiple instead (zero weight rows/cols + masked store)."""
    cap = max(unit, (cap // unit) * unit)
    return min(cap, _round_up(extent, unit))


def _tpu_generation_params():
    """Generation-aware budgets:
    (vmem_limit_bytes, tile_h_cap, tile_w_cap,
     img_double_buffer_budget_bytes, resident_weight_budget_bytes)."""
    try:
        kind = jax.devices()[0].device_kind.lower()
    except Exception:  # pragma: no cover - defensive
        kind = ""
    if any(g in kind for g in ("v4", "v5", "v6")):
        # 128 MiB physical VMEM: big tiles, generous double-buffering.
        return 100 * 1024 * 1024, 512, 1024, 48 * 1024 * 1024, 8 * 1024 * 1024
    # v7x (64 MiB physical VMEM) or unknown: stay conservative.
    return 48 * 1024 * 1024, 256, 512, 24 * 1024 * 1024, 4 * 1024 * 1024


# ----------------------------------------------------------------------------
# Pallas kernels
# ----------------------------------------------------------------------------
def _resize_kernel_h_first(wh_ref, img_ref, wwt_ref, out_ref, tmp_ref, *,
                           compute_dtype, tw, resident_w, round_output, clip_range):
    # grid = (C, H tiles, W tiles); W tiles innermost.
    # tmp = Wh_tile @ img depends only on (c, h-tile): compute once, reuse
    # across all W tiles.  tmp is stored in compute_dtype (no per-step cast).
    @pl.when(pl.program_id(2) == 0)
    def _():
        tmp_ref[...] = jnp.dot(
            wh_ref[...], img_ref[...].astype(compute_dtype),
            preferred_element_type=jnp.float32).astype(tmp_ref.dtype)

    if resident_w:
        # Full Ww^T stays resident in VMEM; slice this step's lane tile.
        j = pl.program_id(2)
        wwt = wwt_ref[:, pl.ds(pl.multiple_of(j * tw, 128), tw)]
    else:
        wwt = wwt_ref[...]

    res = jnp.dot(tmp_ref[...], wwt, preferred_element_type=jnp.float32)
    if round_output:
        res = jnp.clip(jnp.round(res), clip_range[0], clip_range[1])
    out_ref[...] = res.astype(out_ref.dtype)


def _resize_kernel_w_first(wh_ref, img_ref, wwt_ref, out_ref, tmp_ref, *,
                           compute_dtype, th, resident_h, round_output, clip_range):
    # grid = (C, W tiles, H tiles); H tiles innermost.
    # tmp = img @ Wwt_tile depends only on (c, w-tile): compute once, reuse
    # across all H tiles.
    @pl.when(pl.program_id(2) == 0)
    def _():
        tmp_ref[...] = jnp.dot(
            img_ref[...].astype(compute_dtype), wwt_ref[...],
            preferred_element_type=jnp.float32).astype(tmp_ref.dtype)

    if resident_h:
        i = pl.program_id(2)
        wh = wh_ref[pl.ds(pl.multiple_of(i * th, 8), th), :]
    else:
        wh = wh_ref[...]

    res = jnp.dot(wh, tmp_ref[...], preferred_element_type=jnp.float32)
    if round_output:
        res = jnp.clip(jnp.round(res), clip_range[0], clip_range[1])
    out_ref[...] = res.astype(out_ref.dtype)


# ----------------------------------------------------------------------------
# Wrapper (equivalent of custom_Resize.forward for tensor inputs)
# ----------------------------------------------------------------------------
def custom_resize_forward(img, bbox, size, *, tile_h_cap=None, tile_w_cap=None,
                          use_bf16_inputs=False):
    """img: (C, H, W). bbox: (N, 4) in (xmin, ymin, w, h) or None.
    size: int or (H_out, W_out)."""
    if isinstance(size, int):
        size = (size, size)
    C, H_in, W_in = img.shape
    H_out, W_out = int(size[0]), int(size[1])
    out_dtype = img.dtype

    (vmem_limit, def_h_cap, def_w_cap,
     img_dbuf_budget, resident_budget) = _tpu_generation_params()
    tile_h_cap = def_h_cap if tile_h_cap is None else tile_h_cap
    tile_w_cap = def_w_cap if tile_w_cap is None else tile_w_cap

    if jnp.issubdtype(img.dtype, jnp.floating):
        compute_dtype = img.dtype          # bf16 stays bf16 into the MXU
        if use_bf16_inputs and jnp.dtype(img.dtype).itemsize > 2:
            # Opt-in: bf16 MXU inputs, f32 accumulation. ~4x MXU rate, half the
            # VMEM/HBM footprint; breaks exact f32 parity so off by default.
            compute_dtype = jnp.bfloat16
            img = img.astype(jnp.bfloat16)
        round_output = False
        clip_range = (0.0, 0.0)            # unused
    else:
        compute_dtype = jnp.float32        # integer images: compute in f32,
        round_output = True                # round + clamp before the cast back
        info = jnp.iinfo(img.dtype)
        clip_range = (float(info.min), float(info.max))

    # Sublane unit for output tiles depends on output dtype packing
    # (f32: 8, bf16: 16, u8/i8: 32) so stores stay on native tiles.
    sub_unit = 8 * max(1, 4 // jnp.dtype(out_dtype).itemsize)

    TH = _pick_tile(H_out, sub_unit, max(tile_h_cap, sub_unit))
    TW = _pick_tile(W_out, 128, max(tile_w_cap, 128))
    H_pad = _round_up(H_out, TH)
    W_pad = _round_up(W_out, TW)
    n_h = H_pad // TH
    n_w = W_pad // TW

    wh = _bilinear_matrix(H_in, H_out, H_pad, compute_dtype)       # (H_pad, H_in)
    wwt = _bilinear_matrix(W_in, W_out, W_pad, compute_dtype).T    # (W_in, W_pad)

    # Matmul order: contract the dimension that shrinks the most first.
    macs_h_first = H_out * H_in * W_in + H_out * W_in * W_out
    macs_w_first = H_in * W_in * W_out + H_in * H_out * W_out
    h_first = macs_h_first <= macs_w_first

    item = jnp.dtype(compute_dtype).itemsize

    # Full image block is resident per channel; drop to single-buffering when
    # double-buffering it would dominate the VMEM budget (critical on v7x).
    img_block_bytes = H_in * W_in * jnp.dtype(img.dtype).itemsize
    img_kwargs = {}
    if 2 * img_block_bytes > img_dbuf_budget:
        img_kwargs["pipeline_mode"] = pl.Buffered(1)
    img_spec = pl.BlockSpec((pl.Squeezed(), H_in, W_in),
                            lambda c, a, b: (c, 0, 0), **img_kwargs)

    if h_first:
        # Keep the whole Ww^T resident (single fetch) when small; otherwise it
        # would be re-DMAed C*n_h times by the inner W loop.
        resident_w = n_w > 1 and (W_in * W_pad * item) <= resident_budget
        kernel = functools.partial(
            _resize_kernel_h_first, compute_dtype=compute_dtype, tw=TW,
            resident_w=resident_w, round_output=round_output, clip_range=clip_range)
        grid = (C, n_h, n_w)                                   # W tiles innermost
        wh_spec = pl.BlockSpec((TH, H_in), lambda c, i, j: (i, 0))
        if resident_w:
            wwt_spec = pl.BlockSpec((W_in, W_pad), lambda c, i, j: (0, 0))
        else:
            wwt_spec = pl.BlockSpec((W_in, TW), lambda c, i, j: (0, j))
        out_spec = pl.BlockSpec((pl.Squeezed(), TH, TW), lambda c, i, j: (c, i, j))
        tmp_scratch = pltpu.VMEM((TH, W_in), compute_dtype)
        macs = macs_h_first
    else:
        resident_h = n_h > 1 and (H_pad * H_in * item) <= resident_budget
        kernel = functools.partial(
            _resize_kernel_w_first, compute_dtype=compute_dtype, th=TH,
            resident_h=resident_h, round_output=round_output, clip_range=clip_range)
        grid = (C, n_w, n_h)                                   # H tiles innermost
        if resident_h:
            wh_spec = pl.BlockSpec((H_pad, H_in), lambda c, j, i: (0, 0))
        else:
            wh_spec = pl.BlockSpec((TH, H_in), lambda c, j, i: (i, 0))
        wwt_spec = pl.BlockSpec((W_in, TW), lambda c, j, i: (0, j))
        out_spec = pl.BlockSpec((pl.Squeezed(), TH, TW), lambda c, j, i: (c, i, j))
        tmp_scratch = pltpu.VMEM((H_in, TW), compute_dtype)
        macs = macs_w_first

    bytes_accessed = (img.size * jnp.dtype(img.dtype).itemsize
                      + wh.size * item + wwt.size * item
                      + C * H_out * W_out * jnp.dtype(out_dtype).itemsize)
    cost = pl.CostEstimate(flops=2 * C * macs, transcendentals=0,
                           bytes_accessed=bytes_accessed)

    resized = pl.pallas_call(
        kernel,
        out_shape=jax.ShapeDtypeStruct((C, H_out, W_out), out_dtype),
        grid_spec=pltpu.PrefetchScalarGridSpec(
            num_scalar_prefetch=0,
            grid=grid,
            in_specs=[wh_spec, img_spec, wwt_spec],
            out_specs=out_spec,
            scratch_shapes=[tmp_scratch],
        ),
        compiler_params=pltpu.CompilerParams(
            dimension_semantics=("parallel", "parallel", "arbitrary"),
            vmem_limit_bytes=vmem_limit,
        ),
        cost_estimate=cost,
    )(wh, img, wwt)

    if bbox is None:
        return resized, None

    # (xmin, ymin, width, height) rescale — tiny (N,4) elementwise op: plain
    # JAX, since a standalone pallas_call here is pure launch overhead.
    ratio_h = jnp.float32(H_out) / jnp.float32(H_in)
    ratio_w = jnp.float32(W_out) / jnp.float32(W_in)
    scale = jnp.array([ratio_w, ratio_h, ratio_w, ratio_h], dtype=jnp.float32)
    bbox_resized = bbox.astype(jnp.float32) * scale[None, :]
    return resized, bbox_resized


# ----------------------------------------------------------------------------
# Demo
# ----------------------------------------------------------------------------
if __name__ == "__main__":
    key = jax.random.PRNGKey(0)
    k_img, k_box, k_img2, k_img3, k_img4 = jax.random.split(key, 5)

    # --- Test 1: f32 downscale (module defaults) + bbox rescale -------------
    C, H_in, W_in = 3, 16, 16
    size = (8, 8)
    img = jax.random.uniform(k_img, (C, H_in, W_in), dtype=jnp.float32)
    bbox = jax.random.uniform(k_box, (2, 4), dtype=jnp.float32) * 16.0  # (x, y, w, h)

    out, bbox_out = custom_resize_forward(img, bbox, size)
    jax.block_until_ready(out)
    jax.block_until_ready(bbox_out)
    assert out.shape == (C, size[0], size[1]) and bbox_out.shape == bbox.shape

    wh_r = _bilinear_matrix(H_in, size[0], size[0], jnp.float32)
    ww_r = _bilinear_matrix(W_in, size[1], size[1], jnp.float32)
    ref = jnp.einsum("oh,chw,pw->cop", wh_r, img, ww_r)
    assert jnp.allclose(out, ref, atol=1e-5, rtol=1e-5)
    ratio = jnp.array([size[1] / W_in, size[0] / H_in, size[1] / W_in, size[0] / H_in],
                      dtype=jnp.float32)
    assert jnp.allclose(bbox_out, bbox * ratio[None, :], atol=1e-5)

    # --- Test 2: w-first order, resident Wh slab, masked W edge store -------
    C2, H_in2, W_in2 = 2, 8, 64
    size2 = (64, 40)                       # upscale H, non-128-aligned W_out
    img2 = jax.random.uniform(k_img2, (C2, H_in2, W_in2), dtype=jnp.float32)
    out2, _ = custom_resize_forward(img2, None, size2, tile_h_cap=32)
    jax.block_until_ready(out2)
    assert out2.shape == (C2, size2[0], size2[1])
    wh_r2 = _bilinear_matrix(H_in2, size2[0], size2[0], jnp.float32)
    ww_r2 = _bilinear_matrix(W_in2, size2[1], size2[1], jnp.float32)
    ref2 = jnp.einsum("oh,chw,pw->cop", wh_r2, img2, ww_r2)
    assert jnp.allclose(out2, ref2, atol=1e-4, rtol=1e-4)

    # --- Test 3: h-first order with resident Ww^T slab, multi W tiles -------
    C3, H_in3, W_in3 = 2, 64, 32
    size3 = (16, 256)
    img3 = jax.random.uniform(k_img4, (C3, H_in3, W_in3), dtype=jnp.float32)
    out3, _ = custom_resize_forward(img3, None, size3, tile_w_cap=128)
    jax.block_until_ready(out3)
    assert out3.shape == (C3, size3[0], size3[1])
    wh_r3 = _bilinear_matrix(H_in3, size3[0], size3[0], jnp.float32)
    ww_r3 = _bilinear_matrix(W_in3, size3[1], size3[1], jnp.float32)
    ref3 = jnp.einsum("oh,chw,pw->cop", wh_r3, img3, ww_r3)
    assert jnp.allclose(out3, ref3, atol=1e-4, rtol=1e-4)

    # --- Test 4: integer (uint8) image: f32 compute, round + clamp + cast ---
    img4 = jax.random.randint(k_img3, (3, 16, 16), 0, 256, dtype=jnp.int32).astype(jnp.uint8)
    out4, _ = custom_resize_forward(img4, None, (8, 8))
    jax.block_until_ready(out4)
    assert out4.dtype == jnp.uint8 and out4.shape == (3, 8, 8)
    tmp_ref4 = jnp.einsum("oh,chw->cow", wh_r, img4.astype(jnp.float32))
    ref4 = jnp.einsum("cow,pw->cop", tmp_ref4, ww_r)
    ref4 = jnp.clip(jnp.round(ref4), 0, 255).astype(jnp.uint8)
    assert jnp.max(jnp.abs(out4.astype(jnp.int32) - ref4.astype(jnp.int32))) <= 1

    print("KERNEL_OK")
</pallas_src>

<mosaic_0001>
module attributes {stable_mosaic.version = 11 : i64} {
  func.func @_resize_kernel_h_first(%arg0: i32, %arg1: i32, %arg2: i32, %arg3: memref<8x16xf32, #tpu.memory_space<vmem>>, %arg4: memref<1x16x16xf32, #tpu.memory_space<vmem>>, %arg5: memref<16x128xf32, #tpu.memory_space<vmem>>, %arg6: memref<1x8x128xf32, #tpu.memory_space<vmem>>, %arg7: memref<8x16xf32, #tpu.memory_space<vmem>>) attributes {dimension_semantics = [#tpu.dimension_semantics<parallel>, #tpu.dimension_semantics<parallel>, #tpu.dimension_semantics<arbitrary>], iteration_bounds = array<i64: 3, 1, 1>, scalar_prefetch = 0 : i64, scratch_operands = 1 : i64, tpu.core_type = #tpu.core_type<tc>, window_params = [{transform_indices = @transform_0, window_bounds = array<i64: 8, 16>}, {transform_indices = @transform_1, window_bounds = array<i64: 1, 16, 16>}, {transform_indices = @transform_2, window_bounds = array<i64: 16, 128>}, {transform_indices = @transform_3, window_bounds = array<i64: 1, 8, 128>}]} {
    %c0_i32 = arith.constant 0 : i32
    %0 = arith.cmpi eq, %arg2, %c0_i32 : i32
    %1 = arith.extui %0 : i1 to i32
    %c0_i32_0 = arith.constant 0 : i32
    %2 = arith.cmpi ne, %1, %c0_i32_0 : i32
    scf.if %2 {
      %c0_7 = arith.constant 0 : index
      %c0_8 = arith.constant 0 : index
      %9 = vector.load %arg3[%c0_7, %c0_8] : memref<8x16xf32, #tpu.memory_space<vmem>>, vector<8x16xf32>
      %c0_9 = arith.constant 0 : index
      %c0_10 = arith.constant 0 : index
      %c0_11 = arith.constant 0 : index
      %10 = vector.load %arg4[%c0_9, %c0_10, %c0_11] : memref<1x16x16xf32, #tpu.memory_space<vmem>>, vector<1x16x16xf32>
      %11 = vector.shape_cast %10 : vector<1x16x16xf32> to vector<16x16xf32>
      %cst_12 = arith.constant dense<0.000000e+00> : vector<8x16xf32>
      %12 = tpu.matmul %9, %11, %cst_12 {dimension_numbers = #tpu.dot_dimension_numbers<[1], [0], [0], [1], [0, 0, 1, 1], [], []>} : vector<8x16xf32>, vector<16x16xf32>, vector<8x16xf32> -> vector<8x16xf32>
      %c0_13 = arith.constant 0 : index
      %c0_14 = arith.constant 0 : index
      %13 = vector.load %arg7[%c0_13, %c0_14] : memref<8x16xf32, #tpu.memory_space<vmem>>, vector<8x16xf32>
      tpu.vector_store %arg7[%c0_13, %c0_14], %12 {strides = array<i32>} : memref<8x16xf32, #tpu.memory_space<vmem>>, vector<8x16xf32>,
    } else {
    }
    %c0 = arith.constant 0 : index
    %c0_1 = arith.constant 0 : index
    %3 = vector.load %arg5[%c0, %c0_1] : memref<16x128xf32, #tpu.memory_space<vmem>>, vector<16x128xf32>
    %c0_2 = arith.constant 0 : index
    %c0_3 = arith.constant 0 : index
    %4 = vector.load %arg7[%c0_2, %c0_3] : memref<8x16xf32, #tpu.memory_space<vmem>>, vector<8x16xf32>
    %cst = arith.constant dense<0.000000e+00> : vector<8x128xf32>
    %5 = tpu.matmul %4, %3, %cst {dimension_numbers = #tpu.dot_dimension_numbers<[1], [0], [0], [1], [0, 0, 1, 1], [], []>} : vector<8x16xf32>, vector<16x128xf32>, vector<8x128xf32> -> vector<8x128xf32>
    %c0_4 = arith.constant 0 : index
    %c0_5 = arith.constant 0 : index
    %c0_6 = arith.constant 0 : index
    %6 = vector.load %arg6[%c0_4, %c0_5, %c0_6] : memref<1x8x128xf32, #tpu.memory_space<vmem>>, vector<1x8x128xf32>
    %7 = vector.shape_cast %6 : vector<1x8x128xf32> to vector<8x128xf32>
    %8 = vector.shape_cast %5 : vector<8x128xf32> to vector<1x8x128xf32>
    tpu.vector_store %arg6[%c0_4, %c0_5, %c0_6], %8 {strides = array<i32>} : memref<1x8x128xf32, #tpu.memory_space<vmem>>, vector<1x8x128xf32>,
    return
  }
  func.func @transform_0(%arg0: i32, %arg1: i32, %arg2: i32) -> (i32, i32) {
    %c0_i32 = arith.constant 0 : i32
    %c0_i32_0 = arith.constant 0 : i32
    return %arg1, %c0_i32 : i32, i32
  }
  func.func @transform_1(%arg0: i32, %arg1: i32, %arg2: i32) -> (i32, i32, i32) {
    %c0_i32 = arith.constant 0 : i32
    %c0_i32_0 = arith.constant 0 : i32
    %c0_i32_1 = arith.constant 0 : i32
    return %arg0, %c0_i32, %c0_i32_0 : i32, i32, i32
  }
  func.func @transform_2(%arg0: i32, %arg1: i32, %arg2: i32) -> (i32, i32) {
    %c0_i32 = arith.constant 0 : i32
    %c0_i32_0 = arith.constant 0 : i32
    return %c0_i32, %arg2 : i32, i32
  }
  func.func @transform_3(%arg0: i32, %arg1: i32, %arg2: i32) -> (i32, i32, i32) {
    %c0_i32 = arith.constant 0 : i32
    return %arg0, %arg1, %arg2 : i32, i32, i32
  }
}

</mosaic_0001>

<bundles_post_ra>
// kernel: tpu_custom_call.1
= control target key start
LH: loop header
LB: loop body
LE: loop exit
PB: predicated region body
PF: predicated region fallthrough
CT: control target
= control target key end

     0   :  { %s917_s0 = inlined_call_operand.hbm [shape: f32[8,16], index: 0, kind: input, shape index: {}]   ;;  %s918_s1 = inlined_call_operand.hbm [shape: f32[3,16,16], index: 1, kind: input, shape index: {}]   ;;  %s919_s2 = inlined_call_operand.hbm [shape: f32[16,128], index: 2, kind: input, shape index: {}]   ;;  %s920_s3 = inlined_call_operand.hbm [shape: f32[3,8,8], index: 3, kind: output, shape index: {}]  }
   0x1   :  { %923 = sst [smem:[#allocation14_spill]] %s917_s0 }
   0x2   :  { %8 = vsyncpa [#allocation4], 0 }
   0x3   :  { %9 = vsyncpa [#allocation7], 0 }
   0x4   :  { %11 = vsyncpa [#allocation7 + $0x1], 0 }
   0x5   :  { %12 = vsyncpa [#allocation5], 0 }
   0x6   :  { %14 = vsyncpa [#allocation5 + $0x1], 0  ;;  %s757_s12 = smov 0   ;;  %s759_s13 = smov 0  }
   0x7   :  { %s761_s14 = smov 0   ;;  %s763_s15 = smov 0  }
   0x8   :  { %s765_s16 = smov 0   ;;  %s767_s17 = smov 0  }
   0x9 LB: > { %s788_s18 = sadd.s32 4294967295, %s731_s17   ;;  %s446_s19 = sadd.s32 4294967294, %s731_s17   ;;  %s731_s17 = sphi %s767_s17, %s20_s17   ;;  %s727_s16 = sphi %s765_s16, %s936_s16   ;;  %s723_s15 = sphi %s763_s15, %s935_s15   ;;  %s719_s14 = sphi %s761_s14, %s934_s14   ;;  %s715_s13 = sphi %s759_s13, %s933_s13   ;;  %s711_s12 = sphi %s757_s12, %s932_s12  }
   0xa   : > { %p85_p0 = scmp.ne.s32.totalorder %s715_s13, %s711_s12  ;;  %p86_p1 = scmp.eq.s32.totalorder %s788_s18, 0 }
   0xb   : > { %p139_p2 = scmp.eq.s32.totalorder %s788_s18, 2  ;;  %p145_p3 = scmp.eq.s32.totalorder %s446_s19, 2 }
   0xc   : > { %p797_p4 = por %p86_p1, %p85_p0  ;;  %p447_p5 = scmp.ge.s32.totalorder %s731_s17, 1 }
   0xd   : > { %p802_p6 = por %p145_p3, %p85_p0  ;;  %p152_p7 = scmp.lt.s32.totalorder %s731_s17, 4 }
   0xe   : > { %s179_s24 = sshll.u32 %s919_s2, 4  ;;  %s733_s26 = smov [#allocation8]   ;;  %s180_s24 = int_to_ptr.hbm [resolvable:$true] %s179_s24 }
   0xf   : > { %p810_p8 = pnand %p447_p5, %p152_p7  ;;  %s181_s27 = sshll.u32 %s733_s26, 4  ;;  %s182_s27 = int_to_ptr.vmem [resolvable:$true] %s181_s27 }
  0x10   : > { %s927_s0 = sld [smem:[#allocation14_spill]]  ;;  %s921_s4 = smov 128  }
  0x11   : > { %p478_p9 = pneg %p810_p8  ;;  %s922_s5 = smov 8  }
  0x12   : > { %s736_s6 = smov [#allocation3]   ;;  %s39_s8 = sadd.s32 1, %s727_s16 }
  0x13   : > { %p479_p10 = pnand %p478_p9, %p86_p1  ;;  %s168_s7 = sshll.u32 %s736_s6, 4  ;;  %s169_s7 = int_to_ptr.vmem [resolvable:$true] %s168_s7 }
  0x14   : > { %s72_s9 = sadd.s32 1, %s719_s14  ;;  %p41_p11 = scmp.ge.s32.totalorder %s39_s8, 3 }
  0x15   : > { %484 = dma.hbm_to_vmem [thread:$0]  (!%p479_p10), %s180_s24, 256, %s182_s27, [#allocation7], %s921_s4, %s921_s4, %s922_s5  }
  0x16   : > { %s166_s30 = sshll.u32 %s927_s0, 4  ;;  %p79_p12 = scmp.ne.s32.totalorder %s719_s14, %s715_s13  ;;  %s167_s30 = int_to_ptr.hbm [resolvable:$true] %s166_s30 }
  0x17   : > { %481 = dma.hbm_to_vmem [thread:$0]  (!%p479_p10), %s167_s30, 128, %s169_s7, [#allocation4]  }
  0x18   : > { %p80_p13 = scmp.eq.s32.totalorder %s731_s17, 0  ;;  %p495_p0 = scmp.lt.s32.totalorder %s731_s17, 3 }
  0x19   : > { %s938_s8 = smov (%p41_p11, %s39_s8), 0  ;;  %p838_p5 = por %p139_p2, %p79_p12 }
  0x1a   : > { %p832_p3 = por %p80_p13, %p79_p12  ;;  %s69_s19 = ssub.s32 %s727_s16, %s938_s8 }
  0x1b   : > { %s195_s22 = sand.u32 1, %s731_s17   ;;  %p70_p7 = scmp.eq.s32.totalorder %s69_s19, 0 }
  0x1c   : > { %s197_s23 = sand.u32 1, %s719_s14   ;;  %s465_s24 = sshll.u32 %s727_s16, 4 }
  0x1d   : > { %s848_s26 = scalar_select %p70_p7, %s719_s14, %s72_s9  }
  0x1e   : > { %s451_s27 = sshll.u32 %s197_s23, 4  ;;  %s204_s30 = scalar_lea.hbm %s918_s1, %s465_s24 }
  0x1f   : > { %s205_s6 = sshll.u32 %s204_s30, 4  ;;  %s199_s7 = scalar_lea.vmem [#allocation6], %s451_s27  ;;  %s206_s6 = int_to_ptr.hbm [resolvable:$true] %s205_s6 }
  0x20   : > { %s207_s4 = sshll.u32 %s199_s7, 4  ;;  %p486_p2 = pnand %p495_p0, %p832_p3  ;;  %s208_s4 = int_to_ptr.vmem [resolvable:$true] %s207_s4 }
  0x21   : > { %s196_s5 = scalar_lea.sflag [#allocation7], %s195_s22  ;;  %s930_s0 = smov 8  }
  0x22   : > { %s931_s19 = smov 128   ;;  %219 = sbr.rel (%p810_p8) target bundleno = 313 (0x139), region = 32 }
  0x23   : > { %488 = dma.hbm_to_vmem [thread:$0]  (!%p486_p2), %s206_s6, 256, %s208_s4, %s196_s5, %s931_s19, %s931_s19, %s930_s0  }
  0x27   : > { %694 = dma.done.wait (%p86_p1), [#allocation4], 128  }
  0x28   : > { %696 = vsyncadd (%p86_p1), [#allocation4], 4294967168  ;;  %s226_s9 = sand.u32 1, %s788_s18   ;;  %s868_s10 = sand.u32 1, %s715_s13  }
  0x29   : > { %s456_s22 = sshll.u32 %s868_s10, 4  ;;  %s227_s23 = scalar_lea.sflag [#allocation7], %s226_s9 }
  0x2a   : > { %s230_s24 = scalar_lea.vmem [#allocation6], %s456_s22 }
  0x2b   : > { %698 = dma.done.wait (%p797_p4), %s227_s23, 256  }
  0x2c   : > { %700 = vsyncadd (%p797_p4), %s227_s23, 4294967040 }
  0x2d   : > { %702 = dma.done.wait (%p86_p1), [#allocation7], 256  }
  0x2e   : > { %704 = vsyncadd (%p86_p1), [#allocation7], 4294967040  ;;  %v265_v0 = vld [vmem:[%s230_s24 + $0x8] sm:$0xff]  ;;  %v264_v1 = vld [vmem:[%s230_s24] sm:$0xff]  ;;  %vm266_vm0 = vcmask 130048   ;;  %s458_s0 = sshll.u32 %s868_s10, 3 }
  0x2f   : > { %284 = vmatpush.msra.mxu0 %v265_v0  ;;  %v263_v2 = vld [vmem:[#allocation3] sm:$0xff]  ;;  %v292_v3 = vld [vmem:[#allocation8 + $0x8] sm:$0xff]  ;;  %v291_v4 = vld [vmem:[#allocation8] sm:$0xff]  ;;  %s462_s18 = sshll.u32 %s723_s15, 3  ;;  %s258_s5 = scalar_lea.vmem [#allocation9], %s458_s0 }
  0x30   : > { %312 = vmatpush.msra.mxu1 %v292_v3  ;;  %s332_s4 = scalar_lea.hbm %s920_s3, %s462_s18  ;;  %s334_s27 = sshll.u32 %s258_s5, 4  ;;  %s335_s27 = int_to_ptr.vmem [resolvable:$true] %s334_s27 }
  0x31   : > { %285 = vmatpush.msra.mxu0 %v264_v1  ;;  %s336_s28 = sshll.u32 %s332_s4, 4  ;;  %s320_s29 = scalar_lea.sflag [#allocation5], %s868_s10  ;;  %s337_s28 = int_to_ptr.hbm [resolvable:$true] %s336_s28 }
  0x32   : > { %459 = vmatmul.msk.f32.vlgmr.msra.gmra.mxu0 %vm266_vm0, %v263_v2  ;;  %313 = vmatpush.msra.mxu1 %v291_v4  ;;  %s655_s30 = sshra.s32 %s337_s28, 4  ;;  %s661_s19 = scalar_lea.hbm %s920_s3, 24  ;;  %s656_s30 = int_to_ptr.hbm [resolvable:$true] %s655_s30 }
  0x33   : > { %s657_s6 = scalar_lea.hbm %s656_s30, 8  ;;  %p662_p9 = scmp.lt.s32.totalorder %s656_s30, %s920_s3 }
  0x34   : > { %p658_p1 = scmp.ne.s32.totalorder %s656_s30, %s657_s6  ;;  %p663_p10 = scmp.lt.s32.totalorder %s661_s19, %s657_s6 }
  0x36   : > { %p659_p4 = pnand %p658_p1, %p838_p5  ;;  %p664_p11 = por %p663_p10, %p662_p9 }
  0x38   : > { %p660_p8 = pneg %p659_p4 }
  0x3a   : > { %p665_p12 = pnand %p664_p11, %p660_p8 }
  0xaf   : > { %v287_v5 = vpop.f32.mrf.mxu0 }
  0xb0   : > { %290 = vst.msk [vmem:[#allocation2] sm:$0xff] %vm266_vm0, %v287_v5 }
  0xb7   : > { %v293_v6 = vld [vmem:[#allocation2] sm:$0xff] }
  0xb8   : > { %460 = vmatmul.msk.f32.vlgmr.msra.gmra.mxu1 %vm266_vm0, %v293_v6 }
 0x135   : > { %v315_v7 = vpop.f32.mrf.mxu1 }
 0x136   : > { %318 = vst [vmem:[%s258_s5] sm:$0xff] %v315_v7 }
 0x137   : > { %668 = shalt.err (!%p665_p12)
}
 0x138   : > { %476 = dma.vmem_to_hbm [thread:$0]  (%p838_p5), %s335_s27, 128, %s337_s28, %s320_s29  }
 0x139 PF: > { %p498_p13 = scmp.ge.s32.totalorder %s731_s17, 2  ;;  %s348_s10 = sand.u32 1, %s711_s12  }
 0x13a   : > { %s349_s23 = scalar_lea.sflag [#allocation5], %s348_s10 }
 0x13b   : > { %p490_p0 = pnand %p498_p13, %p802_p6 }
 0x13d   : > { %p491_p3 = pneg %p490_p0 }
 0x13f   : > { %706 = dma.done.wait (%p491_p3), %s349_s23, 128  }
 0x140   : > { %708 = vsyncadd (%p491_p3), %s349_s23, 4294967168  ;;  %s20_s17 = sadd.s32 1, %s731_s17   ;;  %s932_s12 = smov %s715_s13 }
 0x141   : > { %p17_p7 = scmp.ge.s32.totalorder %s20_s17, 5   ;;  %s933_s13 = smov %s719_s14 }
 0x142   : > { %s934_s14 = smov %s848_s26  ;;  %s935_s15 = smov %s727_s16 }
 0x143   : > { %s936_s16 = smov %s938_s8  ;;  %19 = sbr.rel (!%p17_p7) target bundleno = 9 (0x9), region = 92 }
 0x148   :  { %355 = vsyncpa [#allocation4], 1 }
 0x149   :  { %357 = vsyncpa [#allocation4 + $0x1], 1 }
 0x14a   :  { %358 = vsyncpa [#allocation7], 1 }
 0x14b   :  { %360 = vsyncpa [#allocation7 + $0x1], 1 }
 0x14c   :  { %361 = vsyncpa [#allocation5], 1 }
 0x14d   :  { %363 = vsyncpa [#allocation5 + $0x1], 1 }

</bundles_post_ra>
